<compile_context>
chip_gen: v6e
topology: v6e:2x2x1
jax: 0.10.0
libtpu: 0.0.40
codegen_flags: <defaults>
</compile_context>

<pallas_src>
import functools

import jax
import jax.numpy as jnp
from jax import lax
from jax.experimental import pallas as pl
from jax.experimental.pallas import tpu as pltpu


def _crop_copy_kernel(x_ref, o_ref, *, rows_to_crop, cols_to_crop):
    # x_ref: (Tnc, H, W) input planes for this (nc-tile, d) grid point.
    # o_ref: (Tnc, H_out, W_out) cropped output planes.
    _, h_out, w_out = o_ref.shape
    o_ref[...] = x_ref[:, rows_to_crop:rows_to_crop + h_out,
                       cols_to_crop:cols_to_crop + w_out]


def _largest_divisor_at_most(n, cap):
    cap = max(1, min(n, cap))
    for d in range(cap, 0, -1):
        if n % d == 0:
            return d
    return 1


def crop_layer(x, crop_set):
    """Pallas implementation of CropLayer.forward.

    crop_set follows the PyTorch module convention: (heis, rows, cols) are
    non-positive, static Python ints; the amount cropped from each side is the
    negation.
    """
    heis_to_crop = -crop_set[0]
    rows_to_crop = -crop_set[1]
    cols_to_crop = -crop_set[2]
    assert heis_to_crop >= 0 and rows_to_crop >= 0 and cols_to_crop >= 0

    # Identity fast path (no kernel).
    if heis_to_crop == 0 and rows_to_crop == 0 and cols_to_crop == 0:
        return x

    N, C, D, H, W = x.shape
    D_out = D - 2 * heis_to_crop
    H_out = H - 2 * rows_to_crop
    W_out = W - 2 * cols_to_crop
    assert D_out > 0 and H_out > 0 and W_out > 0

    # Depth-only crop is a contiguous slab copy per (n, c): let XLA do it
    # rather than paying Pallas grid-step overhead for a pure slice.
    if rows_to_crop == 0 and cols_to_crop == 0:
        return lax.slice_in_dim(x, heis_to_crop, heis_to_crop + D_out, axis=2)

    # General path: H and/or W are cropped.  Merge N and C (free view) and
    # block many (n, c) planes per grid step to amortize per-step overhead.
    NC = N * C
    x4 = x.reshape(NC, D, H, W)

    dtype_bytes = jnp.dtype(x.dtype).itemsize
    # Per-(n, c) VMEM bytes for one depth slice: input plane + output plane.
    bytes_per_nc = (H * W + H_out * W_out) * dtype_bytes
    # Keep one buffer set around ~2 MiB; double-buffering brings the total to
    # ~4 MiB, well under the 32 MiB scoped-VMEM limit on every generation and
    # leaving headroom on v7x's 64 MiB physical VMEM.
    target_block_bytes = 2 * 1024 * 1024
    tnc = _largest_divisor_at_most(NC, target_block_bytes // max(1, bytes_per_nc))

    kernel = functools.partial(
        _crop_copy_kernel,
        rows_to_crop=rows_to_crop,
        cols_to_crop=cols_to_crop,
    )

    # Size-1 (Squeezed) block along D => the index_map entry is an element
    # index, so the depth-crop offset is absorbed by the HBM->VMEM DMA and
    # only the needed depth slices are ever read.
    in_spec = pl.BlockSpec(
        (tnc, pl.Squeezed(), H, W),
        lambda nct, d: (nct, d + heis_to_crop, 0, 0),
    )
    out_spec = pl.BlockSpec(
        (tnc, pl.Squeezed(), H_out, W_out),
        lambda nct, d: (nct, d, 0, 0),
    )

    out4 = pl.pallas_call(
        kernel,
        out_shape=jax.ShapeDtypeStruct((NC, D_out, H_out, W_out), x.dtype),
        grid=(NC // tnc, D_out),
        in_specs=[in_spec],
        out_specs=out_spec,
        compiler_params=pltpu.CompilerParams(
            dimension_semantics=("parallel", "parallel"),
            vmem_limit_bytes=32 * 1024 * 1024,
        ),
    )(x4)

    return out4.reshape(N, C, D_out, H_out, W_out)


def _reference_crop(x, crop_set):
    heis = -crop_set[0]
    rows = -crop_set[1]
    cols = -crop_set[2]
    d_sl = slice(heis, -heis) if heis > 0 else slice(None)
    h_sl = slice(rows, -rows) if rows > 0 else slice(None)
    w_sl = slice(cols, -cols) if cols > 0 else slice(None)
    return x[:, :, d_sl, h_sl, w_sl]


if __name__ == "__main__":
    key = jax.random.PRNGKey(0)
    # Small NCDHW input: batch=2, channels=4, depth=8, height=16, width=16
    x = jax.random.normal(key, (2, 4, 8, 16, 16), dtype=jnp.float32)

    cases = [
        (-1, -1, -1),  # full 3-D crop      (Pallas kernel)
        (-1, -2, 0),   # depth + rows crop  (Pallas kernel)
        (0, -3, 0),    # rows-only crop     (Pallas kernel)
        (0, 0, -1),    # cols-only crop     (Pallas kernel)
        (-2, 0, 0),    # depth-only crop    (lax.slice fast path)
        (0, 0, 0),     # identity           (no-op fast path)
    ]
    for cs in cases:
        out = jax.block_until_ready(crop_layer(x, cs))
        ref = _reference_crop(x, cs)
        assert out.shape == ref.shape, (cs, out.shape, ref.shape)
        assert jnp.allclose(out, ref), f"mismatch for crop_set={cs}"

    print("KERNEL_OK")
</pallas_src>

<mosaic_0001>
module attributes {stable_mosaic.version = 11 : i64} {
  func.func @_crop_copy_kernel(%arg0: i32, %arg1: i32, %arg2: memref<8x1x16x16xf32, #tpu.memory_space<vmem>>, %arg3: memref<8x1x14x14xf32, #tpu.memory_space<vmem>>) attributes {dimension_semantics = [#tpu.dimension_semantics<parallel>, #tpu.dimension_semantics<parallel>], iteration_bounds = array<i64: 1, 6>, scalar_prefetch = 0 : i64, scratch_operands = 0 : i64, tpu.core_type = #tpu.core_type<tc>, window_params = [{transform_indices = @transform_0, window_bounds = array<i64: 8, 1, 16, 16>}, {transform_indices = @transform_1, window_bounds = array<i64: 8, 1, 14, 14>}]} {
    %c0 = arith.constant 0 : index
    %c0_0 = arith.constant 0 : index
    %c1 = arith.constant 1 : index
    %c1_1 = arith.constant 1 : index
    %0 = vector.load %arg2[%c0, %c0_0, %c1, %c1_1] : memref<8x1x16x16xf32, #tpu.memory_space<vmem>>, vector<8x1x14x14xf32>
    %1 = vector.shape_cast %0 : vector<8x1x14x14xf32> to vector<8x14x14xf32>
    %c0_2 = arith.constant 0 : index
    %c0_3 = arith.constant 0 : index
    %c0_4 = arith.constant 0 : index
    %c0_5 = arith.constant 0 : index
    %2 = vector.load %arg3[%c0_2, %c0_3, %c0_4, %c0_5] : memref<8x1x14x14xf32, #tpu.memory_space<vmem>>, vector<8x1x14x14xf32>
    %3 = vector.shape_cast %2 : vector<8x1x14x14xf32> to vector<8x14x14xf32>
    %4 = vector.shape_cast %1 : vector<8x14x14xf32> to vector<8x1x14x14xf32>
    tpu.vector_store %arg3[%c0_2, %c0_3, %c0_4, %c0_5], %4 {strides = array<i32>} : memref<8x1x14x14xf32, #tpu.memory_space<vmem>>, vector<8x1x14x14xf32>,
    return
  }
  func.func @transform_0(%arg0: i32, %arg1: i32) -> (i32, i32, i32, i32) {
    %c1_i32 = arith.constant 1 : i32
    %0 = arith.addi %arg1, %c1_i32 : i32
    %c0_i32 = arith.constant 0 : i32
    %c0_i32_0 = arith.constant 0 : i32
    %c0_i32_1 = arith.constant 0 : i32
    return %arg0, %0, %c0_i32, %c0_i32_0 : i32, i32, i32, i32
  }
  func.func @transform_1(%arg0: i32, %arg1: i32) -> (i32, i32, i32, i32) {
    %c0_i32 = arith.constant 0 : i32
    %c0_i32_0 = arith.constant 0 : i32
    %c0_i32_1 = arith.constant 0 : i32
    return %arg0, %arg1, %c0_i32, %c0_i32_0 : i32, i32, i32, i32
  }
}

</mosaic_0001>

<bundles_post_ra>
// kernel: tpu_custom_call.1
= control target key start
LH: loop header
LB: loop body
LE: loop exit
PB: predicated region body
PF: predicated region fallthrough
CT: control target
= control target key end

     0   :  { %6 = vsyncpa [#allocation3], 0  ;;  %s845_s0 = inlined_call_operand.hbm [shape: f32[8,8,16,16], index: 0, kind: input, shape index: {}]   ;;  %s846_s1 = inlined_call_operand.vmem [shape: f32[8,6,14,14], index: 1, kind: output, shape index: {}]  }
   0x1   :  { %8 = vsyncpa [#allocation3 + $0x1], 0  ;;  %s646_s6 = smov 0   ;;  %s648_s7 = smov 0  }
   0x2   :  { %s650_s8 = smov 0   ;;  %s652_s9 = smov 0  }
   0x3   :  { %s654_s10 = smov 0   ;;  %s656_s11 = smov 0  }
   0x4   :  { %s658_s12 = smov 0   ;;  %s660_s13 = smov 0  }
   0x5 LB: > { %s462_s14 = sadd.s32 4294967295, %s627_s13   ;;  %s23_s15 = sadd.s32 1, %s623_s12  ;;  %s627_s13 = sphi %s660_s13, %s14_s13   ;;  %s623_s12 = sphi %s658_s12, %s856_s12   ;;  %s619_s11 = sphi %s656_s11, %s855_s11   ;;  %s615_s10 = sphi %s654_s10, %s854_s10   ;;  %s611_s9 = sphi %s652_s9, %s853_s9   ;;  %s607_s8 = sphi %s650_s8, %s852_s8   ;;  %s603_s7 = sphi %s648_s7, %s851_s7   ;;  %s599_s6 = sphi %s646_s6, %s850_s6  }
   0x6   : > { %p24_p0 = scmp.ge.s32.totalorder %s23_s15, 6  ;;  %s37_s16 = sadd.s32 1, %s615_s10 }
   0x7   : > { %p44_p1 = scmp.ne.s32.totalorder %s615_s10, %s611_s9  ;;  %p45_p2 = scmp.eq.s32.totalorder %s627_s13, 0 }
   0x8   : > { %s690_s17 = scalar_select %p24_p0, 0, %s23_s15  }
   0x9   : > { %p692_p3 = por %p45_p2, %p44_p1  ;;  %p50_p4 = scmp.ne.s32.totalorder %s611_s9, %s607_s8 }
   0xa   : > { %s31_s19 = sadd.s32 1, %s690_s17  ;;  %p51_p5 = scmp.eq.s32.totalorder %s462_s14, 0 }
   0xb   : > { %s33_s20 = ssub.s32 %s23_s15, %s31_s19  ;;  %s61_s21 = ssub.s32 %s623_s12, %s690_s17 }
   0xc   : > { %p35_p6 = scmp.eq.s32.totalorder %s33_s20, 0  ;;  %p700_p7 = por %p51_p5, %p50_p4 }
   0xd   : > { %p63_p8 = scmp.eq.s32.totalorder %s61_s21, 0  ;;  %s65_s23 = sadd.s32 1, %s603_s7 }
   0xe   : > { %s706_s24 = scalar_select %p35_p6, %s615_s10, %s37_s16  }
   0xf   : > { %s709_s25 = scalar_select %p63_p8, %s603_s7, %s65_s23  }
  0x10   : > { %p75_p9 = scmp.ne.s32.totalorder %s603_s7, %s599_s6  ;;  %p76_p10 = scmp.eq.s32.totalorder %s462_s14, 5 }
  0x11   : > { %p465_p12 = scmp.ge.s32.totalorder %s627_s13, 6 }
  0x12   : > { %p713_p11 = por %p76_p10, %p75_p9 }
  0x13   : > { %98 = sbr.rel (%p465_p12) target bundleno = 38 (0x26), region = 16 }
  0x18   : > { %s102_s27 = sand.u32 1, %s615_s10   ;;  %s479_s28 = sshll.u32 %s623_s12, 8 }
  0x19   : > { %s466_s29 = sshll.u32 %s102_s27, 7  ;;  %s407_s3 = scalar_lea.hbm %s845_s0, %s479_s28 }
  0x1a   : > { %s408_s4 = scalar_lea.hbm %s407_s3, 256  ;;  %s106_s8 = scalar_lea.vmem [#allocation2], %s466_s29 }
  0x1b   : > { %s481_s5 = scalar_select %p692_p3, [#allocation0], [#allocation7] }
  0x1c   : > { %s129_s14 = sshll.u32 %s106_s8, 4  ;;  %s629_s16 = smov 2048   ;;  %s130_s14 = int_to_ptr.vmem [resolvable:$true] %s129_s14 }
  0x1d   : > { %s121_s15 = sld [smem:[%s481_s5]]   ;;  %s630_s19 = smov 256  }
  0x1e   : > { %482 = sst [smem:[#allocation6]] (%p692_p3), %s629_s16  ;;  %s631_s20 = smov 2  }
  0x1f   : > { %483 = sst [smem:[#allocation6 + $0x1]] (%p692_p3), %s630_s19  ;;  %s632_s21 = smov 128  }
  0x20   : > { %484 = sst [smem:[#allocation6 + $0x2]] (%p692_p3), %s631_s20  ;;  %s633_s28 = smov 8  }
  0x21   : > { %485 = sst [smem:[#allocation6 + $0x3]] (%p692_p3), %s632_s21  ;;  %s103_s30 = scalar_lea.sflag [#allocation3], %s102_s27 }
  0x22   : > { %486 = sst [smem:[#allocation6 + $0x4]] (%p692_p3), %s632_s21  ;;  %s634_s2 = smov 131072  }
  0x23   : > { %s469_s23 = sshll.u32 %s121_s15, 26  ;;  %487 = sst [smem:[#allocation6 + $0x5]] (%p692_p3), %s633_s28 }
  0x24   : > { %s470_s29 = sadd.s32 134217728, %s469_s23 }
  0x25   : > { %488 = dma.general (%p692_p3), %s408_s4, 2048, %s130_s14, %s103_s30, %s634_s2, [#allocation6], %s470_s29, 0  }
  0x26 PF: > { %p471_p13 = scmp.ge.s32.totalorder %s627_s13, 1  ;;  %p150_p0 = scmp.lt.s32.totalorder %s627_s13, 7 }
  0x28   : > { %p151_p1 = pnand %p471_p13, %p150_p0 }
  0x29   : > { %s156_s3 = sand.u32 (!%p151_p1), 1, %s611_s9  }
  0x2a   : > { %154 = sbr.rel (%p151_p1) target bundleno = 202 (0xca), region = 24  ;;  %s472_s5 = sshll.u32 (!%p151_p1), %s156_s3, 7 }
  0x2b   : > { %s157_s8 = scalar_lea.sflag (!%p151_p1), [#allocation3], %s156_s3  ;;  %s742_s15 = scalar_lea.vmem (!%p151_p1), [#allocation2], %s472_s5 }
  0x2f   : > { %594 = dma.done.wait (%p700_p7), %s157_s8, 2048  }
  0x30   : > { %596 = vsyncadd (%p700_p7), %s157_s8, 4294965248  ;;  %v183_v0 = vld [vmem:[%s742_s15 + $0x11] sm:$0xff]  ;;  %v181_v1 = vld [vmem:[%s742_s15 + $0x1] sm:$0xff]  ;;  %s635_s18 = smov 127   ;;  %s175_s22 = sand.u32 1, %s599_s6   ;;  %vm261_vm0 = vcmask 113664  }
  0x31   : > { %217 = vrot.lane.b32.xlu1 %v183_v0, %s635_s18  ;;  %213 = vrot.lane.b32.xlu0 %v181_v1, %s635_s18  ;;  %v184_v2 = vld [vmem:[%s742_s15 + $0x19] sm:$0x3f]  ;;  %v182_v3 = vld [vmem:[%s742_s15 + $0x9] sm:$0x3f]  ;;  %s473_s27 = sshll.u32 %s175_s22, 7  ;;  %vm263_vm1 = vcmask 111616  }
  0x32   : > { %v186_v4 = vld [vmem:[%s742_s15 + $0x29] sm:$0x3f]  ;;  %v185_v5 = vld [vmem:[%s742_s15 + $0x21] sm:$0xff]  ;;  %v188_v6 = vld [vmem:[%s742_s15 + $0x39] sm:$0x3f]  ;;  %s765_s4 = scalar_lea.vmem [#allocation4], %s473_s27 }
  0x33   : > { %v187_v7 = vld [vmem:[%s742_s15 + $0x31] sm:$0xff]  ;;  %v190_v8 = vld [vmem:[%s742_s15 + $0x49] sm:$0x3f]  ;;  %v189_v9 = vld [vmem:[%s742_s15 + $0x41] sm:$0xff]  ;;  %s480_s6 = sshll.u32 (%p713_p11), %s619_s11, 4 }
  0x34   : > { %v192_v10 = vld [vmem:[%s742_s15 + $0x59] sm:$0x3f]  ;;  %v191_v11 = vld [vmem:[%s742_s15 + $0x51] sm:$0xff]  ;;  %v194_v12 = vld [vmem:[%s742_s15 + $0x69] sm:$0x3f]  ;;  %s291_s19 = scalar_lea.vmem (%p713_p11), %s846_s1, %s480_s6 }
  0x35   : > { %219 = vrot.lane.b32.xlu1 %v184_v2, %s635_s18  ;;  %215 = vrot.lane.b32.xlu0 %v182_v3, %s635_s18  ;;  %v193_v13 = vld [vmem:[%s742_s15 + $0x61] sm:$0xff]  ;;  %v196_v14 = vld [vmem:[%s742_s15 + $0x79] sm:$0x3f] }
  0x36   : > { %v195_v15 = vld [vmem:[%s742_s15 + $0x71] sm:$0xff] }
  0x39   : > { %223 = vrot.lane.b32.xlu1 %v186_v4, %s635_s18  ;;  %221 = vrot.lane.b32.xlu0 %v185_v5, %s635_s18 }
  0x3d   : > { %227 = vrot.lane.b32.xlu1 %v188_v6, %s635_s18  ;;  %225 = vrot.lane.b32.xlu0 %v187_v7, %s635_s18 }
  0x41   : > { %231 = vrot.lane.b32.xlu1 %v190_v8, %s635_s18  ;;  %229 = vrot.lane.b32.xlu0 %v189_v9, %s635_s18 }
  0x45   : > { %235 = vrot.lane.b32.xlu1 %v192_v10, %s635_s18  ;;  %233 = vrot.lane.b32.xlu0 %v191_v11, %s635_s18 }
  0x49   : > { %239 = vrot.lane.b32.xlu1 %v194_v12, %s635_s18  ;;  %237 = vrot.lane.b32.xlu0 %v193_v13, %s635_s18 }
  0x4d   : > { %243 = vrot.lane.b32.xlu1 %v196_v14, %s635_s18  ;;  %241 = vrot.lane.b32.xlu0 %v195_v15, %s635_s18 }
  0xa3   : > { %v218_v16 = vpop.permute.xlu1 %217  ;;  %v214_v17 = vpop.permute.xlu0 %213 }
  0xa4   : > { %265 = vst.msk [vmem:[%s765_s4 + $0x10] sm:$0xff] %vm261_vm0, %v218_v16  ;;  %262 = vst.msk [vmem:[%s765_s4] sm:$0xff] %vm261_vm0, %v214_v17 }
  0xa7   : > { %v220_v18 = vpop.permute.xlu1 %219  ;;  %v216_v19 = vpop.permute.xlu0 %215 }
  0xa8   : > { %266 = vst.msk [vmem:[%s765_s4 + $0x18] sm:$0x3f] %vm263_vm1, %v220_v18  ;;  %264 = vst.msk [vmem:[%s765_s4 + $0x8] sm:$0x3f] %vm263_vm1, %v216_v19 }
  0xab   : > { %v224_v20 = vpop.permute.xlu1 %223  ;;  %v222_v21 = vpop.permute.xlu0 %221  ;;  %v350_v32 = vld [vmem:[%s765_s4] sm:$0xff] (%p713_p11)  ;;  %v354_v34 = vld [vmem:[%s765_s4 + $0x10] sm:$0xff] (%p713_p11) }
  0xac   : > { %268 = vst.msk [vmem:[%s765_s4 + $0x28] sm:$0x3f] %vm263_vm1, %v224_v20  ;;  %351 = vst [vmem:[%s291_s19] sm:$0xff] (%p713_p11), %v350_v32 }
  0xad   : > { %267 = vst.msk [vmem:[%s765_s4 + $0x20] sm:$0xff] %vm261_vm0, %v222_v21  ;;  %355 = vst [vmem:[%s291_s19 + $0x60] sm:$0xff] (%p713_p11), %v354_v34 }
  0xaf   : > { %v228_v22 = vpop.permute.xlu1 %227  ;;  %v226_v23 = vpop.permute.xlu0 %225  ;;  %v352_v33 = vld [vmem:[%s765_s4 + $0x8] sm:$0xff] (%p713_p11)  ;;  %v356_v35 = vld [vmem:[%s765_s4 + $0x18] sm:$0xff] (%p713_p11) }
  0xb0   : > { %270 = vst.msk [vmem:[%s765_s4 + $0x38] sm:$0x3f] %vm263_vm1, %v228_v22  ;;  %353 = vst [vmem:[%s291_s19 + $0x8] sm:$0xff] (%p713_p11), %v352_v33 }
  0xb1   : > { %269 = vst.msk [vmem:[%s765_s4 + $0x30] sm:$0xff] %vm261_vm0, %v226_v23  ;;  %357 = vst [vmem:[%s291_s19 + $0x68] sm:$0xff] (%p713_p11), %v356_v35 }
  0xb3   : > { %v232_v24 = vpop.permute.xlu1 %231  ;;  %v230_v25 = vpop.permute.xlu0 %229  ;;  %v360_v37 = vld [vmem:[%s765_s4 + $0x28] sm:$0xff] (%p713_p11) }
  0xb4   : > { %272 = vst.msk [vmem:[%s765_s4 + $0x48] sm:$0x3f] %vm263_vm1, %v232_v24  ;;  %v358_v36 = vld [vmem:[%s765_s4 + $0x20] sm:$0xff] (%p713_p11)  ;;  %361 = vst [vmem:[%s291_s19 + $0xc8] sm:$0xff] (%p713_p11), %v360_v37 }
  0xb5   : > { %271 = vst.msk [vmem:[%s765_s4 + $0x40] sm:$0xff] %vm261_vm0, %v230_v25  ;;  %359 = vst [vmem:[%s291_s19 + $0xc0] sm:$0xff] (%p713_p11), %v358_v36 }
  0xb7   : > { %v236_v26 = vpop.permute.xlu1 %235  ;;  %v234_v27 = vpop.permute.xlu0 %233  ;;  %v364_v39 = vld [vmem:[%s765_s4 + $0x38] sm:$0xff] (%p713_p11) }
  0xb8   : > { %274 = vst.msk [vmem:[%s765_s4 + $0x58] sm:$0x3f] %vm263_vm1, %v236_v26  ;;  %v362_v38 = vld [vmem:[%s765_s4 + $0x30] sm:$0xff] (%p713_p11)  ;;  %365 = vst [vmem:[%s291_s19 + $0x128] sm:$0xff] (%p713_p11), %v364_v39 }
  0xb9   : > { %273 = vst.msk [vmem:[%s765_s4 + $0x50] sm:$0xff] %vm261_vm0, %v234_v27  ;;  %363 = vst [vmem:[%s291_s19 + $0x120] sm:$0xff] (%p713_p11), %v362_v38 }
  0xbb   : > { %v240_v28 = vpop.permute.xlu1 %239  ;;  %v238_v29 = vpop.permute.xlu0 %237  ;;  %v368_v41 = vld [vmem:[%s765_s4 + $0x48] sm:$0xff] (%p713_p11) }
  0xbc   : > { %276 = vst.msk [vmem:[%s765_s4 + $0x68] sm:$0x3f] %vm263_vm1, %v240_v28  ;;  %v366_v40 = vld [vmem:[%s765_s4 + $0x40] sm:$0xff] (%p713_p11)  ;;  %369 = vst [vmem:[%s291_s19 + $0x188] sm:$0xff] (%p713_p11), %v368_v41 }
  0xbd   : > { %275 = vst.msk [vmem:[%s765_s4 + $0x60] sm:$0xff] %vm261_vm0, %v238_v29  ;;  %285 = sbr.rel (!%p713_p11) target bundleno = 202 (0xca), region = 32  ;;  %367 = vst [vmem:[%s291_s19 + $0x180] sm:$0xff] (%p713_p11), %v366_v40 }
  0xbf   : > { %v244_v30 = vpop.permute.xlu1 %243  ;;  %v242_v31 = vpop.permute.xlu0 %241  ;;  %v372_v43 = vld [vmem:[%s765_s4 + $0x58] sm:$0xff] (%p713_p11) }
  0xc0   : > { %278 = vst.msk [vmem:[%s765_s4 + $0x78] sm:$0x3f] %vm263_vm1, %v244_v30  ;;  %v370_v42 = vld [vmem:[%s765_s4 + $0x50] sm:$0xff] (%p713_p11)  ;;  %373 = vst [vmem:[%s291_s19 + $0x1e8] sm:$0xff] (%p713_p11), %v372_v43 }
  0xc1   : > { %277 = vst.msk [vmem:[%s765_s4 + $0x70] sm:$0xff] %vm261_vm0, %v242_v31  ;;  %371 = vst [vmem:[%s291_s19 + $0x1e0] sm:$0xff] (%p713_p11), %v370_v42 }
  0xc3   : > { %v376_v45 = vld [vmem:[%s765_s4 + $0x68] sm:$0xff] }
  0xc4   : > { %v374_v44 = vld [vmem:[%s765_s4 + $0x60] sm:$0xff]  ;;  %377 = vst [vmem:[%s291_s19 + $0x248] sm:$0xff] %v376_v45 }
  0xc5   : > { %375 = vst [vmem:[%s291_s19 + $0x240] sm:$0xff] %v374_v44 }
  0xc7   : > { %v380_v47 = vld [vmem:[%s765_s4 + $0x78] sm:$0xff] }
  0xc8   : > { %v378_v46 = vld [vmem:[%s765_s4 + $0x70] sm:$0xff]  ;;  %381 = vst [vmem:[%s291_s19 + $0x2a8] sm:$0xff] %v380_v47 }
  0xc9   : > { %379 = vst [vmem:[%s291_s19 + $0x2a0] sm:$0xff] %v378_v46 }
  0xca PF: > { %s14_s13 = sadd.s32 1, %s627_s13   ;;  %s850_s6 = smov %s603_s7 }
  0xcb   : > { %p11_p2 = scmp.ge.s32.totalorder %s14_s13, 8   ;;  %s851_s7 = smov %s709_s25 }
  0xcc   : > { %s852_s8 = smov %s611_s9  ;;  %s853_s9 = smov %s615_s10 }
  0xcd   : > { %s854_s10 = smov %s706_s24  ;;  %s855_s11 = smov %s623_s12 }
  0xce   : > { %s856_s12 = smov %s690_s17  ;;  %13 = sbr.rel (!%p11_p2) target bundleno = 5 (0x5), region = 107 }
  0xd3   :  { %397 = vsyncpa [#allocation3], 1 }
  0xd4   :  { %399 = vsyncpa [#allocation3 + $0x1], 1 }

</bundles_post_ra>
